<compile_context>
chip_gen: v7x
topology: tpu7x:2x2x1
jax: 0.10.0
libtpu: 0.0.40
codegen_flags: <defaults>
</compile_context>

<pallas_src>
import jax
import jax.numpy as jnp
from jax import lax
from jax.experimental import pallas as pl
from jax.experimental.pallas import tpu as pltpu


def _round_up(v, m):
    return ((v + m - 1) // m) * m


def _text_classifier_kernel(x_ref, w_ref, b_ref, o_ref):
    # x_ref: (TB, E) bf16   w_ref: (C_pad, E) bf16   b_ref: (1, C_pad) f32
    # o_ref: (TB, C_pad) f32
    # Padded class columns carry bias = -1e30 (their weight rows are 0), so
    # they drop out of the max/exp/logsumexp without any explicit mask.
    logits = lax.dot_general(
        x_ref[...], w_ref[...],
        dimension_numbers=(((1,), (1,)), ((), ())),   # x @ W.T on the MXU
        preferred_element_type=jnp.float32,
    ) + b_ref[...]

    # Numerically stable log_softmax along the class axis (all f32).
    m = jnp.max(logits, axis=1, keepdims=True)
    shifted = logits - m
    lse = jnp.log(jnp.sum(jnp.exp(shifted), axis=1, keepdims=True))
    o_ref[...] = (shifted - lse).astype(o_ref.dtype)


def pad_classifier_params(weight, bias, *, lane=128, param_dtype=jnp.bfloat16):
    """One-time parameter prep (do at init, NOT on the per-call path).

    weight: (C, E)  PyTorch nn.Linear layout (not transposed here)
    bias:   (C,)
    Returns (w_pad, b_pad) with the class axis padded to a multiple of `lane`;
    padded bias columns are -1e30 so padded logits vanish in the logsumexp.
    """
    C, E = weight.shape
    C_pad = _round_up(C, lane)
    w_pad = jnp.zeros((C_pad, E), param_dtype).at[:C, :].set(
        weight.astype(param_dtype))
    b_pad = jnp.full((1, C_pad), -1e30, jnp.float32).at[0, :C].set(
        bias.astype(jnp.float32))
    return w_pad, b_pad


def text_classifier_forward(x, w_pad, b_pad, *, block_b=1024):
    """log_softmax(x @ W.T + b, axis=1), class axis padded to C_pad lanes.

    x:     (B, E)      activations (cast to w_pad.dtype for the MXU)
    w_pad: (C_pad, E)  padded weight from pad_classifier_params
    b_pad: (1, C_pad)  padded bias (-1e30 in padded columns)
    Returns (B, C_pad) float32; the real classes are columns [:C].  Consumers
    slice lazily -- avoids an extra full HBM read+write pass here.
    """
    B, E = x.shape
    C_pad, Ew = w_pad.shape
    assert Ew == E

    # In a real model the activations already arrive in the compute dtype.
    if x.dtype != w_pad.dtype:
        x = x.astype(w_pad.dtype)

    x_bytes = jnp.dtype(x.dtype).itemsize
    w_bytes = jnp.dtype(w_pad.dtype).itemsize

    # ---- VMEM-aware batch-tile selection --------------------------------
    try:
        vmem_cap = pltpu.get_tpu_info().vmem_capacity_bytes
    except Exception:
        vmem_cap = 64 * 1024 * 1024           # conservative (v7x per-TC)
    budget = int(vmem_cap * 0.75)             # headroom for compiler scratch

    resident = C_pad * E * w_bytes + C_pad * 4          # single-buffered W, b
    per_row = 2 * E * x_bytes + 2 * C_pad * 4           # dbl-buffered x + out
    tb_cap = max(16, (budget - resident) // per_row)
    tb_cap = (tb_cap // 16) * 16 or 16

    # Aim for >= 4 batch tiles (megacore sharding on v7x + DMA/compute
    # overlap); TB multiple of 16 respects the bf16 (16,128) sublane tile.
    tb_target = _round_up(max(1, pl.cdiv(B, 4)), 16)
    TB = min(block_b, tb_cap, tb_target)
    if TB >= B:
        TB = B                                # tiny batch: single full tile
    grid = (pl.cdiv(B, TB),)

    required = resident + TB * per_row
    vmem_limit = int(min(vmem_cap, max(required * 3 // 2, 8 * 1024 * 1024)))

    cost = pl.CostEstimate(
        flops=2 * B * E * C_pad,
        transcendentals=B * C_pad + B,        # exp per element + log per row
        bytes_accessed=(B * E * x_bytes + C_pad * E * w_bytes
                        + C_pad * 4 + B * C_pad * 4),
    )

    # TODO(synk): for vocab-scale C (C_pad*E threatening VMEM), add a class
    # grid axis (last, "arbitrary") with an online max/logsumexp accumulator
    # instead of keeping the whole padded weight resident.
    return pl.pallas_call(
        _text_classifier_kernel,
        out_shape=jax.ShapeDtypeStruct((B, C_pad), jnp.float32),
        grid_spec=pltpu.PrefetchScalarGridSpec(
            num_scalar_prefetch=0,
            grid=grid,
            in_specs=[
                pl.BlockSpec((TB, E), lambda i: (i, 0)),          # batch-tiled x
                pl.BlockSpec((C_pad, E), lambda i: (0, 0),
                             pipeline_mode=pl.Buffered(1)),        # resident W
                pl.BlockSpec((1, C_pad), lambda i: (0, 0),
                             pipeline_mode=pl.Buffered(1)),        # resident b
            ],
            out_specs=pl.BlockSpec((TB, C_pad), lambda i: (i, 0)),
        ),
        compiler_params=pltpu.CompilerParams(
            dimension_semantics=("parallel",),    # shard batch tiles over TCs
            vmem_limit_bytes=vmem_limit,
        ),
        cost_estimate=cost,
    )(x, w_pad, b_pad)


if __name__ == "__main__":
    key = jax.random.PRNGKey(0)
    k_x, k_w, k_b = jax.random.split(key, 3)

    batch = 8
    embedding_dim = 32
    num_classes = 4

    # Deterministic synthetic nn.Linear(embedding_dim, num_classes) params.
    bound = 1.0 / (embedding_dim ** 0.5)
    weight = jax.random.uniform(k_w, (num_classes, embedding_dim),
                                minval=-bound, maxval=bound, dtype=jnp.float32)
    bias = jax.random.uniform(k_b, (num_classes,),
                              minval=-bound, maxval=bound, dtype=jnp.float32)
    x = jax.random.normal(k_x, (batch, embedding_dim), dtype=jnp.float32)

    # One-time parameter prep (padding + bf16 cast) -- off the per-call path.
    w_pad, b_pad = pad_classifier_params(weight, bias)
    x_bf = x.astype(jnp.bfloat16)          # activations in compute dtype

    out_pad = text_classifier_forward(x_bf, w_pad, b_pad)
    jax.block_until_ready(out_pad)
    out = out_pad[:, :num_classes]         # consumers slice lazily if needed

    # Reference with the same bf16 operand quantization (f32 accumulate).
    logits_ref = (x_bf.astype(jnp.float32)
                  @ w_pad[:num_classes].astype(jnp.float32).T) + bias
    ref = jax.nn.log_softmax(logits_ref, axis=1)

    assert out.shape == (batch, num_classes)
    assert jnp.allclose(out, ref, atol=1e-5, rtol=1e-5), \
        float(jnp.max(jnp.abs(out - ref)))

    # Sanity check against the pure-f32 PyTorch semantics (bf16 operands only
    # add a small quantization error on the logits).
    ref_f32 = jax.nn.log_softmax(x @ weight.T + bias, axis=1)
    assert jnp.allclose(out, ref_f32, atol=5e-2, rtol=5e-2)

    print("KERNEL_OK")
</pallas_src>

<mosaic_0001>
module attributes {stable_mosaic.version = 11 : i64} {
  func.func @_text_classifier_kernel(%arg0: i32, %arg1: memref<8x32xbf16, #tpu.memory_space<vmem>>, %arg2: memref<128x32xbf16, #tpu.memory_space<vmem>>, %arg3: memref<1x128xf32, #tpu.memory_space<vmem>>, %arg4: memref<8x128xf32, #tpu.memory_space<vmem>>) attributes {dimension_semantics = [#tpu.dimension_semantics<parallel>], iteration_bounds = array<i64: 1>, scalar_prefetch = 0 : i64, scratch_operands = 0 : i64, tpu.core_type = #tpu.core_type<tc>, window_params = [{transform_indices = @transform_0, window_bounds = array<i64: 8, 32>}, {pipeline_mode = #tpu.pipeline_mode<synchronous>, transform_indices = @transform_1, window_bounds = array<i64: 128, 32>}, {pipeline_mode = #tpu.pipeline_mode<synchronous>, transform_indices = @transform_2, window_bounds = array<i64: 1, 128>}, {transform_indices = @transform_3, window_bounds = array<i64: 8, 128>}]} {
    %c0 = arith.constant 0 : index
    %c0_0 = arith.constant 0 : index
    %0 = vector.load %arg1[%c0, %c0_0] : memref<8x32xbf16, #tpu.memory_space<vmem>>, vector<8x32xbf16>
    %c0_1 = arith.constant 0 : index
    %c0_2 = arith.constant 0 : index
    %1 = vector.load %arg2[%c0_1, %c0_2] : memref<128x32xbf16, #tpu.memory_space<vmem>>, vector<128x32xbf16>
    %cst = arith.constant dense<0.000000e+00> : vector<8x128xf32>
    %2 = tpu.matmul %0, %1, %cst {dimension_numbers = #tpu.dot_dimension_numbers<[1], [1], [0], [0], [0, 0, 1, 0], [], []>} : vector<8x32xbf16>, vector<128x32xbf16>, vector<8x128xf32> -> vector<8x128xf32>
    %c0_3 = arith.constant 0 : index
    %c0_4 = arith.constant 0 : index
    %3 = vector.load %arg3[%c0_3, %c0_4] : memref<1x128xf32, #tpu.memory_space<vmem>>, vector<1x128xf32>
    %4 = vector.broadcast %3 : vector<1x128xf32> to vector<8x128xf32>
    %5 = arith.addf %2, %4 : vector<8x128xf32>
    %cst_5 = arith.constant dense<0xFF800000> : vector<8xf32>
    %6 = vector.multi_reduction <maximumf>, %5, %cst_5 [1] : vector<8x128xf32> to vector<8xf32>
    %7 = vector.shape_cast %6 : vector<8xf32> to vector<8x1xf32>
    %8 = vector.broadcast %7 : vector<8x1xf32> to vector<8x128xf32>
    %9 = arith.subf %5, %8 : vector<8x128xf32>
    %10 = math.exp %9 : vector<8x128xf32>
    %cst_6 = arith.constant dense<0.000000e+00> : vector<8xf32>
    %11 = vector.multi_reduction <add>, %10, %cst_6 [1] : vector<8x128xf32> to vector<8xf32>
    %12 = vector.shape_cast %11 : vector<8xf32> to vector<8x1xf32>
    %13 = math.log %12 : vector<8x1xf32>
    %14 = vector.broadcast %13 : vector<8x1xf32> to vector<8x128xf32>
    %15 = arith.subf %9, %14 : vector<8x128xf32>
    %c0_7 = arith.constant 0 : index
    %c0_8 = arith.constant 0 : index
    %16 = vector.load %arg4[%c0_7, %c0_8] : memref<8x128xf32, #tpu.memory_space<vmem>>, vector<8x128xf32>
    tpu.vector_store %arg4[%c0_7, %c0_8], %15 {strides = array<i32>} : memref<8x128xf32, #tpu.memory_space<vmem>>, vector<8x128xf32>,
    return
  }
  func.func @transform_0(%arg0: i32) -> (i32, i32) {
    %c0_i32 = arith.constant 0 : i32
    %c0_i32_0 = arith.constant 0 : i32
    return %arg0, %c0_i32 : i32, i32
  }
  func.func @transform_1(%arg0: i32) -> (i32, i32) {
    %c0_i32 = arith.constant 0 : i32
    %c0_i32_0 = arith.constant 0 : i32
    %c0_i32_1 = arith.constant 0 : i32
    return %c0_i32, %c0_i32_0 : i32, i32
  }
  func.func @transform_2(%arg0: i32) -> (i32, i32) {
    %c0_i32 = arith.constant 0 : i32
    %c0_i32_0 = arith.constant 0 : i32
    %c0_i32_1 = arith.constant 0 : i32
    return %c0_i32, %c0_i32_0 : i32, i32
  }
  func.func @transform_3(%arg0: i32) -> (i32, i32) {
    %c0_i32 = arith.constant 0 : i32
    %c0_i32_0 = arith.constant 0 : i32
    return %arg0, %c0_i32 : i32, i32
  }
}

</mosaic_0001>

<bundles_post_ra>
// kernel: tpu_custom_call.1
= control target key start
LH: loop header
LB: loop body
LE: loop exit
PB: predicated region body
PF: predicated region fallthrough
CT: control target
= control target key end

     0   :  { %v251_v1 = vmov 0.0   ;;  %vm80_vm0 = vcmask 261120   ;;  %vm252_vm1 = vmmov 0   ;;  %s325_s0 = inlined_call_operand.vmem [shape: bf16[8,32], index: 0, kind: input, shape index: {}]   ;;  %s326_s1 = inlined_call_operand.vmem [shape: bf16[128,32], index: 1, kind: input, shape index: {}]   ;;  %s327_s2 = inlined_call_operand.vmem [shape: f32[1,128], index: 2, kind: input, shape index: {}]   ;;  %s328_s3 = inlined_call_operand.hbm [shape: f32[8,128], index: 3, kind: output, shape index: {}]  }
   0x1   :  { %v215_v0 = vld [vmem:[%s326_s1] sm:$0xff]   ;;  %192 = vmatprep.subr.bf16.mxu0 %v251_v1  ;;  %v216_v3 = vld [vmem:[%s326_s1 + $0x8] sm:$0xff]   ;;  %208 = vmatprep.mubr.msk.bf16.mxu0 %vm252_vm1, %v251_v1 }
   0x2   :  { %v85_v2 = vsel %vm80_vm0, %v215_v0, 0  ;;  %v88_v4 = vsel %vm80_vm0, %v216_v3, 0 }
   0x3   :  { %193 = vmatpush3.bf16.xpose.msra.mxu0 %v85_v2 }
   0x4   :  { %194 = vmatprep.subr.bf16.mxu0 %v251_v1 }
   0x5   :  { %8 = vsyncpa [#allocation3], 0  ;;  %v217_v5 = vld [vmem:[%s326_s1 + $0x10] sm:$0xff]   ;;  %v218_v7 = vld [vmem:[%s326_s1 + $0x18] sm:$0xff]  }
   0x6   :  { %v91_v6 = vsel %vm80_vm0, %v217_v5, 0  ;;  %v94_v8 = vsel %vm80_vm0, %v218_v7, 0  ;;  %v219_v9 = vld [vmem:[%s326_s1 + $0x20] sm:$0xff]   ;;  %v220_v11 = vld [vmem:[%s326_s1 + $0x28] sm:$0xff]   ;;  %v221_v13 = vld [vmem:[%s326_s1 + $0x30] sm:$0xff]  }
   0x7   :  { %v97_v10 = vsel %vm80_vm0, %v219_v9, 0  ;;  %v100_v12 = vsel %vm80_vm0, %v220_v11, 0  ;;  %v103_v14 = vsel %vm80_vm0, %v221_v13, 0  ;;  %v222_v15 = vld [vmem:[%s326_s1 + $0x38] sm:$0xff]   ;;  %v16_v17 = vld [vmem:[%s325_s0] sm:$0xf] }
   0x8   :  { %v106_v16 = vsel %vm80_vm0, %v222_v15, 0  ;;  %v173_v18 = vld [vmem:[%s327_s2] ss:$0 sm:$0xff]  ;;  %s253_s0 = smov [#allocation2]  }
   0x9   :  { %s165_s1 = sshll.u32 %s253_s0, 4  ;;  %s166_s1 = int_to_ptr.vmem [resolvable:$true] %s165_s1 }
   0xa   :  { %s227_s2 = scalar_lea.vmem %s166_s1, 128  ;;  %p232_p1 = scmp.lt.s32.totalorder %s166_s1, %s166_s1 }
   0xb   :  { %195 = vmatpush3.bf16.xpose.msra.mxu0 %v88_v4  ;;  %p228_p0 = scmp.ne.s32.totalorder %s166_s1, %s227_s2  ;;  %p233_p2 = scmp.lt.s32.totalorder %s227_s2, %s227_s2 }
   0xc   :  { %196 = vmatprep.subr.bf16.mxu0 %v251_v1 }
   0xd   :  { %p234_p3 = por %p233_p2, %p232_p1 }
   0xf   :  { %p235_p4 = pnand %p234_p3, %p228_p0 }
  0x13   :  { %197 = vmatpush3.bf16.xpose.msra.mxu0 %v91_v6 }
  0x14   :  { %198 = vmatprep.subr.bf16.mxu0 %v251_v1 }
  0x1b   :  { %199 = vmatpush3.bf16.xpose.msra.mxu0 %v94_v8 }
  0x1c   :  { %200 = vmatprep.subr.bf16.mxu0 %v251_v1 }
  0x23   :  { %201 = vmatpush3.bf16.xpose.msra.mxu0 %v97_v10 }
  0x24   :  { %202 = vmatprep.subr.bf16.mxu0 %v251_v1 }
  0x2b   :  { %203 = vmatpush3.bf16.xpose.msra.mxu0 %v100_v12 }
  0x2c   :  { %204 = vmatprep.subr.bf16.mxu0 %v251_v1 }
  0x33   :  { %205 = vmatpush3.bf16.xpose.msra.mxu0 %v103_v14 }
  0x34   :  { %206 = vmatprep.subr.bf16.mxu0 %v251_v1 }
  0x3b   :  { %207 = vmatpush3.bf16.xpose.msra.mxu0 %v106_v16 }
  0x42   :  { %209 = vmatmul.mubr.msk.bf16.vlgmr.msra.gmra.mrb[0].mxu0 %vm80_vm0, %v16_v17 }
 0x115   :  { %v142_v19 = vpop.f32.mrb[0].mxu0 }
 0x116   :  { %v143_v20 = vadd.f32 %v173_v18, %v142_v19  ;;  %v210_v21 = vpop.f32.mrb[1].mxu0 }
 0x117   :  { %v145_v22 = vpop.f32.mrb[2].mxu0 }
 0x118   :  { %148 = vmax.xlane.f32.xlu0 %v143_v20  ;;  %v211_v23 = vpop.f32.mrb[3].mxu0 }
 0x1a5   :  { %v149_v24 = vpop.xlane.xlu0 %148 }
 0x1a6   :  { %v150_v25 = vsub.f32 %v143_v20, %v149_v24 }
 0x1a8   :  { %v151_v26 = vmul.f32 1.442695, %v150_v25 }
 0x1aa   :  { %223 = vpow2.f32 %v151_v26 }
 0x1b4   :  { %v224_v27 = vpop.eup %223 }
 0x1b5   :  { %153 = vadd.xlane.f32.xlu0 %v224_v27 }
 0x242   :  { %v154_v28 = vpop.xlane.xlu0 %153 }
 0x243   :  { %225 = vlog2.f32 %v154_v28 }
 0x24d   :  { %v226_v29 = vpop.eup %225 }
 0x24e   :  { %v156_v30 = vmul.f32 0.6931472, %v226_v29 }
 0x250   :  { %v157_v31 = vsub.f32 %v150_v25, %v156_v30 }
 0x252   :  { %158 = vst [vmem:[#allocation2] sm:$0xff] %v157_v31 }
 0x253   :  { %238 = shalt.err (!%p235_p4)
}
 0x254   :  { %s239_s7 = scalar_lea.hbm %s328_s3, 128 }
 0x255   :  { %p240_p5 = scmp.ne.s32.totalorder %s328_s3, %s239_s7  ;;  %p243_p6 = scmp.lt.u32.totalorder %s239_s7, %s328_s3 }
 0x257   :  { %p245_p7 = pnand %p243_p6, %p240_p5 }
 0x259   :  { %248 = shalt.err (!%p245_p7)
}
 0x25a   :  { %168 = dma.vmem_to_hbm [thread:$0]  %s166_s1, 128, %s328_s3, [#allocation3]  }
 0x25b   :  { %249 = dma.done.wait [#allocation3], 128  }
 0x25c   :  { %250 = vsyncadd [#allocation3], 4294967168 }
 0x25d   :  { %172 = vsyncpa [#allocation3], 1 }

</bundles_post_ra>
